<compile_context>
chip_gen: v7x
topology: tpu7x:2x2x1
jax: 0.10.0
libtpu: 0.0.40
codegen_flags: <defaults>
</compile_context>

<pallas_src>
import functools

import jax
import jax.numpy as jnp
from jax.experimental import pallas as pl
from jax.experimental.pallas import tpu as pltpu


def policy_kernel(x_ref, w1_ref, b1_ref, w2_ref, b2_ref, out_ref):
    # Hidden layer: (TB, obs) @ (obs, 128) + (1, 128) -> ReLU.
    # MXU matmul in the input dtype (bf16 when the wrapper downcasts),
    # f32 accumulation via preferred_element_type.
    h = jnp.dot(x_ref[...], w1_ref[...], preferred_element_type=jnp.float32)
    h = jnp.maximum(h + b1_ref[...], 0.0)

    # Output layer: (TB, 128) @ (128, act_p) + (1, act_p); cast h back to the
    # weight dtype so the second matmul also runs native bf16 on the MXU.
    # act_p is lane-padded to 128: padded columns of w2 are 0 and padded bias
    # entries are -1e30, so padded lanes never win the max and exp() == 0.
    logits = jnp.dot(h.astype(w2_ref.dtype), w2_ref[...],
                     preferred_element_type=jnp.float32)
    logits = logits + b2_ref[...]

    # Softmax over the action dim (dim=1 for 2D input in PyTorch).
    # Max-subtracted for stability; exact divide so rows sum to 1.
    m = jnp.max(logits, axis=-1, keepdims=True)
    e = jnp.exp(logits - m)
    denom = jnp.sum(e, axis=-1, keepdims=True)
    out_ref[...] = (e / denom).astype(out_ref.dtype)


def _round_up(n, m):
    return ((n + m - 1) // m) * m


@functools.partial(
    jax.jit, static_argnames=("block_b", "use_bf16", "allow_core_parallel"))
def policy_network_forward(x, w1, b1, w2, b2, *, block_b=4096, use_bf16=True,
                           allow_core_parallel=True):
    """x: (B, obs) f32; w1: (obs, 128); b1: (1, 128); w2: (128, A); b2: (1, A).

    Returns softmax action probabilities, shape (B, A), float32.
    """
    B, obs = x.shape
    hidden = w1.shape[1]
    act = w2.shape[1]
    act_p = _round_up(act, 128)          # lane-dense output / matmul-2 N dim

    # Compute / output dtypes. bf16 halves the dominant HBM streams (x in,
    # padded probs out) and runs native bf16 on the MXU of all generations;
    # biases, accumulation and the softmax max-subtract stay f32.
    cdt = jnp.bfloat16 if use_bf16 else jnp.float32
    odt = jnp.bfloat16 if use_bf16 else jnp.float32
    sub = 16 if use_bf16 else 8          # bf16 packs 2 rows/sublane

    # Pad batch only to the sublane multiple (<= sub-1 rows), NOT to a multiple
    # of the tile: the ragged last grid block is masked by the pipeline and the
    # garbage rows are sliced off below.
    b_pad = _round_up(B, sub)
    tb = min(_round_up(min(block_b, 8192), sub), b_pad)
    n_blocks = pl.cdiv(b_pad, tb)

    xc = x.astype(cdt)
    if b_pad != B:
        xc = jnp.pad(xc, ((0, b_pad - B), (0, 0)))
    w1c = w1.astype(cdt)
    b1c = b1.astype(jnp.float32)
    # Lane-pad the action dim: zero weight columns, -1e30 bias so padded lanes
    # get probability exactly 0 and never affect the max-subtract.
    w2c = jnp.zeros((hidden, act_p), cdt).at[:, :act].set(w2.astype(cdt))
    b2c = jnp.full((1, act_p), -1e30, jnp.float32).at[:, :act].set(
        b2.astype(jnp.float32))

    # Explicit VMEM budget (per review): x tile is lane-padded 32->128 in VMEM
    # and double-buffered, output tile double-buffered, plus f32 h/logits/exp
    # temps. Clamp to 48 MiB: above v5e's 16 MiB scoped default, comfortably
    # under v7x's 64 MiB physical per TensorCore.
    in_isz = jnp.dtype(cdt).itemsize
    out_isz = jnp.dtype(odt).itemsize
    x_lanes = _round_up(obs, 128)
    per_row_bytes = (2 * x_lanes * in_isz          # x tile, double-buffered
                     + 2 * act_p * out_isz         # out tile, double-buffered
                     + (hidden + 3 * act_p) * 4)   # f32 h / logits / exp temps
    vmem_limit = int(min(max(tb * per_row_bytes + (8 << 20), 16 << 20),
                         48 << 20))

    # Make the v7x 2-TensorCore split real when it can actually help: an even
    # grid of >= 2 steps uses CORE_PARALLEL; otherwise a plain parallel axis
    # (no-op on single-core v5e/v6e, and a 1-step grid can't be split anyway).
    if allow_core_parallel and n_blocks >= 2 and n_blocks % 2 == 0:
        dims = (pltpu.CORE_PARALLEL,)
    else:
        dims = (pltpu.PARALLEL,)

    cost = pl.CostEstimate(
        flops=2 * b_pad * (obs * hidden + hidden * act_p),
        transcendentals=b_pad * act_p,
        bytes_accessed=(b_pad * obs * in_isz          # x read
                        + b_pad * act_p * out_isz     # probs write
                        + obs * hidden * in_isz       # w1
                        + hidden * act_p * in_isz     # w2
                        + (hidden + act_p) * 4),      # biases
    )

    out = pl.pallas_call(
        policy_kernel,
        out_shape=jax.ShapeDtypeStruct((b_pad, act_p), odt),
        grid=(n_blocks,),
        in_specs=[
            # Batch-tiled activations: double-buffered HBM<->VMEM pipeline.
            pl.BlockSpec((tb, obs), lambda i: (i, 0)),
            # Weights / biases: constant index_map -> DMA'd once, VMEM-resident.
            pl.BlockSpec((obs, hidden), lambda i: (0, 0)),
            pl.BlockSpec((1, hidden), lambda i: (0, 0)),
            pl.BlockSpec((hidden, act_p), lambda i: (0, 0)),
            pl.BlockSpec((1, act_p), lambda i: (0, 0)),
        ],
        out_specs=pl.BlockSpec((tb, act_p), lambda i: (i, 0)),
        compiler_params=pltpu.CompilerParams(
            dimension_semantics=dims,
            vmem_limit_bytes=vmem_limit,
        ),
        cost_estimate=cost,
    )(xc, w1c, b1c, w2c, b2c)

    # Drop batch padding and the lane padding of the action dim; return f32.
    return out[:B, :act].astype(jnp.float32)


def init_params(key, observation_space, action_space, hidden=128):
    """Deterministic init mimicking PyTorch nn.Linear default (U[-1/sqrt(fan_in), 1/sqrt(fan_in)])."""
    k1, k2, k3, k4 = jax.random.split(key, 4)
    bound1 = 1.0 / jnp.sqrt(observation_space)
    bound2 = 1.0 / jnp.sqrt(hidden)
    w1 = jax.random.uniform(k1, (observation_space, hidden), jnp.float32, -bound1, bound1)
    b1 = jax.random.uniform(k2, (1, hidden), jnp.float32, -bound1, bound1)
    w2 = jax.random.uniform(k3, (hidden, action_space), jnp.float32, -bound2, bound2)
    b2 = jax.random.uniform(k4, (1, action_space), jnp.float32, -bound2, bound2)
    return w1, b1, w2, b2


if __name__ == "__main__":
    key = jax.random.PRNGKey(0)
    k_x, k_p, k_x2 = jax.random.split(key, 3)

    batch = 8
    observation_space = 32
    action_space = 16

    x = jax.random.normal(k_x, (batch, observation_space), dtype=jnp.float32)
    w1, b1, w2, b2 = init_params(k_p, observation_space, action_space)

    def reference(xv):
        h = jnp.maximum(xv @ w1 + b1, 0.0)
        return jax.nn.softmax(h @ w2 + b2, axis=1)

    # Small demo call (single grid step).
    probs = jax.block_until_ready(policy_network_forward(x, w1, b1, w2, b2))
    assert probs.shape == (batch, action_space)
    # bf16 matmuls / bf16 output => looser tolerances vs. the f32 reference.
    assert jnp.allclose(probs, reference(x), atol=3e-2, rtol=3e-2)
    assert jnp.allclose(jnp.sum(probs, axis=1), 1.0, atol=1e-2)

    # Exercise the batch-tiled grid, ragged-batch padding and lane-padding
    # slice paths (B=40, TB=16 -> 3 grid steps, batch padded 40 -> 48).
    x2 = jax.random.normal(k_x2, (40, observation_space), dtype=jnp.float32)
    probs2 = jax.block_until_ready(
        policy_network_forward(x2, w1, b1, w2, b2, block_b=16))
    assert probs2.shape == (40, action_space)
    assert jnp.allclose(probs2, reference(x2), atol=3e-2, rtol=3e-2)
    assert jnp.allclose(jnp.sum(probs2, axis=1), 1.0, atol=1e-2)

    # f32 escape hatch (exact PyTorch semantics, tighter tolerance).
    probs3 = jax.block_until_ready(
        policy_network_forward(x, w1, b1, w2, b2, use_bf16=False))
    assert jnp.allclose(probs3, reference(x), atol=2e-5, rtol=2e-5)

    print("KERNEL_OK")
</pallas_src>

<mosaic_0001>
module attributes {stable_mosaic.version = 11 : i64} {
  func.func @policy_kernel(%arg0: i32, %arg1: memref<16x32xbf16, #tpu.memory_space<vmem>>, %arg2: memref<32x128xbf16, #tpu.memory_space<vmem>>, %arg3: memref<1x128xf32, #tpu.memory_space<vmem>>, %arg4: memref<128x128xbf16, #tpu.memory_space<vmem>>, %arg5: memref<1x128xf32, #tpu.memory_space<vmem>>, %arg6: memref<16x128xbf16, #tpu.memory_space<vmem>>) attributes {dimension_semantics = [#tpu.dimension_semantics<parallel>], iteration_bounds = array<i64: 1>, scalar_prefetch = 0 : i64, scratch_operands = 0 : i64, tpu.core_type = #tpu.core_type<tc>, window_params = [{transform_indices = @transform_0, window_bounds = array<i64: 16, 32>}, {pipeline_mode = #tpu.pipeline_mode<synchronous>, transform_indices = @transform_1, window_bounds = array<i64: 32, 128>}, {pipeline_mode = #tpu.pipeline_mode<synchronous>, transform_indices = @transform_2, window_bounds = array<i64: 1, 128>}, {pipeline_mode = #tpu.pipeline_mode<synchronous>, transform_indices = @transform_3, window_bounds = array<i64: 128, 128>}, {pipeline_mode = #tpu.pipeline_mode<synchronous>, transform_indices = @transform_4, window_bounds = array<i64: 1, 128>}, {transform_indices = @transform_5, window_bounds = array<i64: 16, 128>}]} {
    %c0 = arith.constant 0 : index
    %c0_0 = arith.constant 0 : index
    %0 = vector.load %arg1[%c0, %c0_0] : memref<16x32xbf16, #tpu.memory_space<vmem>>, vector<16x32xbf16>
    %c0_1 = arith.constant 0 : index
    %c0_2 = arith.constant 0 : index
    %1 = vector.load %arg2[%c0_1, %c0_2] : memref<32x128xbf16, #tpu.memory_space<vmem>>, vector<32x128xbf16>
    %cst = arith.constant dense<0.000000e+00> : vector<16x128xf32>
    %2 = tpu.matmul %0, %1, %cst {dimension_numbers = #tpu.dot_dimension_numbers<[1], [0], [0], [1], [0, 0, 1, 1], [], []>} : vector<16x32xbf16>, vector<32x128xbf16>, vector<16x128xf32> -> vector<16x128xf32>
    %c0_3 = arith.constant 0 : index
    %c0_4 = arith.constant 0 : index
    %3 = vector.load %arg3[%c0_3, %c0_4] : memref<1x128xf32, #tpu.memory_space<vmem>>, vector<1x128xf32>
    %4 = vector.broadcast %3 : vector<1x128xf32> to vector<16x128xf32>
    %5 = arith.addf %2, %4 : vector<16x128xf32>
    %cst_5 = arith.constant 0.000000e+00 : f32
    %6 = vector.broadcast %cst_5 : f32 to vector<16x128xf32>
    %7 = arith.maximumf %5, %6 : vector<16x128xf32>
    %8 = arith.truncf %7 : vector<16x128xf32> to vector<16x128xbf16>
    %c0_6 = arith.constant 0 : index
    %c0_7 = arith.constant 0 : index
    %9 = vector.load %arg4[%c0_6, %c0_7] : memref<128x128xbf16, #tpu.memory_space<vmem>>, vector<128x128xbf16>
    %cst_8 = arith.constant dense<0.000000e+00> : vector<16x128xf32>
    %10 = tpu.matmul %8, %9, %cst_8 {dimension_numbers = #tpu.dot_dimension_numbers<[1], [0], [0], [1], [0, 0, 1, 1], [], []>} : vector<16x128xbf16>, vector<128x128xbf16>, vector<16x128xf32> -> vector<16x128xf32>
    %c0_9 = arith.constant 0 : index
    %c0_10 = arith.constant 0 : index
    %11 = vector.load %arg5[%c0_9, %c0_10] : memref<1x128xf32, #tpu.memory_space<vmem>>, vector<1x128xf32>
    %12 = vector.broadcast %11 : vector<1x128xf32> to vector<16x128xf32>
    %13 = arith.addf %10, %12 : vector<16x128xf32>
    %cst_11 = arith.constant dense<0xFF800000> : vector<16xf32>
    %14 = vector.multi_reduction <maximumf>, %13, %cst_11 [1] : vector<16x128xf32> to vector<16xf32>
    %15 = vector.shape_cast %14 : vector<16xf32> to vector<16x1xf32>
    %16 = vector.broadcast %15 : vector<16x1xf32> to vector<16x128xf32>
    %17 = arith.subf %13, %16 : vector<16x128xf32>
    %18 = math.exp %17 : vector<16x128xf32>
    %cst_12 = arith.constant dense<0.000000e+00> : vector<16xf32>
    %19 = vector.multi_reduction <add>, %18, %cst_12 [1] : vector<16x128xf32> to vector<16xf32>
    %20 = vector.shape_cast %19 : vector<16xf32> to vector<16x1xf32>
    %21 = vector.broadcast %20 : vector<16x1xf32> to vector<16x128xf32>
    %22 = arith.divf %18, %21 : vector<16x128xf32>
    %23 = arith.truncf %22 : vector<16x128xf32> to vector<16x128xbf16>
    %c0_13 = arith.constant 0 : index
    %c0_14 = arith.constant 0 : index
    %24 = vector.load %arg6[%c0_13, %c0_14] : memref<16x128xbf16, #tpu.memory_space<vmem>>, vector<16x128xbf16>
    tpu.vector_store %arg6[%c0_13, %c0_14], %23 {strides = array<i32>} : memref<16x128xbf16, #tpu.memory_space<vmem>>, vector<16x128xbf16>,
    return
  }
  func.func @transform_0(%arg0: i32) -> (i32, i32) {
    %c0_i32 = arith.constant 0 : i32
    %c0_i32_0 = arith.constant 0 : i32
    return %arg0, %c0_i32 : i32, i32
  }
  func.func @transform_1(%arg0: i32) -> (i32, i32) {
    %c0_i32 = arith.constant 0 : i32
    %c0_i32_0 = arith.constant 0 : i32
    %c0_i32_1 = arith.constant 0 : i32
    return %c0_i32, %c0_i32_0 : i32, i32
  }
  func.func @transform_2(%arg0: i32) -> (i32, i32) {
    %c0_i32 = arith.constant 0 : i32
    %c0_i32_0 = arith.constant 0 : i32
    %c0_i32_1 = arith.constant 0 : i32
    return %c0_i32, %c0_i32_0 : i32, i32
  }
  func.func @transform_3(%arg0: i32) -> (i32, i32) {
    %c0_i32 = arith.constant 0 : i32
    %c0_i32_0 = arith.constant 0 : i32
    %c0_i32_1 = arith.constant 0 : i32
    return %c0_i32, %c0_i32_0 : i32, i32
  }
  func.func @transform_4(%arg0: i32) -> (i32, i32) {
    %c0_i32 = arith.constant 0 : i32
    %c0_i32_0 = arith.constant 0 : i32
    %c0_i32_1 = arith.constant 0 : i32
    return %c0_i32, %c0_i32_0 : i32, i32
  }
  func.func @transform_5(%arg0: i32) -> (i32, i32) {
    %c0_i32 = arith.constant 0 : i32
    %c0_i32_0 = arith.constant 0 : i32
    return %arg0, %c0_i32 : i32, i32
  }
}

</mosaic_0001>

<bundles_post_ra>
// kernel: policy_network_forward.1
= control target key start
LH: loop header
LB: loop body
LE: loop exit
PB: predicated region body
PF: predicated region fallthrough
CT: control target
= control target key end

     0   :  { %v327_v0 = vmov 0.0   ;;  %vm328_vm0 = vmmov 0   ;;  %vm51_vm1 = vcmask 261120   ;;  %s401_s1 = inlined_call_operand.vmem [shape: bf16[32,128], index: 1, kind: input, shape index: {}]   ;;  %s402_s3 = inlined_call_operand.vmem [shape: bf16[128,128], index: 3, kind: input, shape index: {}]   ;;  %s403_s0 = inlined_call_operand.vmem [shape: bf16[16,32], index: 0, kind: input, shape index: {}]   ;;  %s404_s2 = inlined_call_operand.vmem [shape: f32[1,128], index: 2, kind: input, shape index: {}]   ;;  %s405_s4 = inlined_call_operand.vmem [shape: f32[1,128], index: 4, kind: input, shape index: {}]   ;;  %s406_s5 = inlined_call_operand.vmem [shape: bf16[16,128], index: 5, kind: output, shape index: {}]  }
   0x1   :  { %278 = vmatprep.subr.bf16.mxu0 %v327_v0  ;;  %v308_v1 = vld [vmem:[%s401_s1] sm:$0xff]   ;;  %282 = vmatprep.mubr.msk.bf16.mxu0 %vm328_vm0, %v327_v0  ;;  %v309_v2 = vld [vmem:[%s401_s1 + $0x8] sm:$0xff]   ;;  %v313_v6 = vld [vmem:[%s402_s3 + $0x10] sm:$0xff]  }
   0x2   :  { %286 = vmatprep.subr.bf16.mxu1 %v327_v0  ;;  %302 = vmatprep.mubr.msk.bf16.mxu1 %vm328_vm0, %v327_v0  ;;  %v311_v3 = vld [vmem:[%s402_s3] sm:$0xff]   ;;  %v312_v5 = vld [vmem:[%s402_s3 + $0x8] sm:$0xff]   ;;  %v314_v7 = vld [vmem:[%s402_s3 + $0x18] sm:$0xff]  }
   0x3   :  { %279 = vmatpush3.bf16.msra.mxu0 %v308_v1  ;;  %v310_v4 = vld [vmem:[%s403_s0] sm:$0xff]   ;;  %287 = vmatpush3.bf16.msra.mxu1 %v311_v3  ;;  %v316_v9 = vld [vmem:[%s402_s3 + $0x28] sm:$0xff]   ;;  %v317_v10 = vld [vmem:[%s402_s3 + $0x30] sm:$0xff]  }
   0x4   :  { %280 = vmatprep.subr.bf16.mxu0 %v327_v0  ;;  %288 = vmatprep.subr.bf16.mxu1 %v327_v0  ;;  %v315_v8 = vld [vmem:[%s402_s3 + $0x20] sm:$0xff]   ;;  %v318_v11 = vld [vmem:[%s402_s3 + $0x38] sm:$0xff]  }
   0x5   :  { %v243_v12 = vld [vmem:[%s404_s2] ss:$0 sm:$0xff] }
   0x6   :  { %v248_v22 = vld [vmem:[%s405_s4] ss:$0 sm:$0xff] }
   0x7   :  { %281 = vmatpush3.bf16.msra.mxu0 %v309_v2  ;;  %289 = vmatpush3.bf16.msra.mxu1 %v312_v5 }
   0x8   :  { %290 = vmatprep.subr.bf16.mxu1 %v327_v0 }
   0xa   :  { %283 = vmatmul.mubr.msk.bf16.vlgmr.msra.gmra.mrb[0].mxu0 %vm51_vm1, %v310_v4 }
   0xb   :  { %291 = vmatpush3.bf16.msra.mxu1 %v313_v6 }
   0xc   :  { %292 = vmatprep.subr.bf16.mxu1 %v327_v0 }
   0xf   :  { %293 = vmatpush3.bf16.msra.mxu1 %v314_v7 }
  0x10   :  { %294 = vmatprep.subr.bf16.mxu1 %v327_v0 }
  0x13   :  { %295 = vmatpush3.bf16.msra.mxu1 %v315_v8 }
  0x14   :  { %296 = vmatprep.subr.bf16.mxu1 %v327_v0 }
  0x17   :  { %297 = vmatpush3.bf16.msra.mxu1 %v316_v9 }
  0x18   :  { %298 = vmatprep.subr.bf16.mxu1 %v327_v0 }
  0x1b   :  { %299 = vmatpush3.bf16.msra.mxu1 %v317_v10 }
  0x1c   :  { %300 = vmatprep.subr.bf16.mxu1 %v327_v0 }
  0x1f   :  { %301 = vmatpush3.bf16.msra.mxu1 %v318_v11 }
  0xdd   :  { %v89_v13 = vpop.f32.mrb[0].mxu0 }
  0xde   :  { %v90_v14 = vadd.f32 %v243_v12, %v89_v13  ;;  %v284_v15 = vpop.f32.mrb[1].mxu0 }
  0xdf   :  { %v92_v16 = vpop.f32.mrb[2].mxu0 }
  0xe0   :  { %v93_v17 = vadd.f32 %v243_v12, %v92_v16  ;;  %v285_v18 = vpop.f32.mrb[3].mxu0  ;;  %v96_v19 = vmax.f32 %v90_v14, 0.0 }
  0xe2   :  { %v97_v20 = vmax.f32 %v93_v17, 0.0 }
  0xe4   :  { %v98_v21 = vpack.c.bf16 %v97_v20, %v96_v19 }
  0xe6   :  { %303 = vmatmul.mubr.bf16.vlgmr.msra.gmra.mrb[0].mxu1 %v98_v21 }
 0x1b9   :  { %v204_v23 = vpop.f32.mrb[0].mxu1 }
 0x1ba   :  { %v205_v24 = vadd.f32 %v248_v22, %v204_v23  ;;  %v304_v25 = vpop.f32.mrb[1].mxu1 }
 0x1bb   :  { %v207_v26 = vpop.f32.mrb[2].mxu1 }
 0x1bc   :  { %211 = vmax.xlane.f32.xlu0 %v205_v24  ;;  %v305_v27 = vpop.f32.mrb[3].mxu1  ;;  %v208_v28 = vadd.f32 %v248_v22, %v207_v26 }
 0x1c0   :  { %213 = vmax.xlane.f32.xlu0 %v208_v28 }
 0x249   :  { %v212_v29 = vpop.xlane.xlu0 %211 }
 0x24a   :  { %v215_v30 = vsub.f32 %v205_v24, %v212_v29 }
 0x24c   :  { %v217_v31 = vmul.f32 1.442695, %v215_v30 }
 0x24d   :  { %v214_v32 = vpop.xlane.xlu0 %213 }
 0x24e   :  { %319 = vpow2.f32 %v217_v31  ;;  %v216_v33 = vsub.f32 %v208_v28, %v214_v32 }
 0x250   :  { %v219_v34 = vmul.f32 1.442695, %v216_v33 }
 0x252   :  { %321 = vpow2.f32 %v219_v34 }
 0x258   :  { %v320_v35 = vpop.eup %319 }
 0x259   :  { %221 = vadd.xlane.f32.xlu1 %v320_v35 }
 0x25c   :  { %v322_v36 = vpop.eup %321 }
 0x25d   :  { %223 = vadd.xlane.f32.xlu1 %v322_v36 }
 0x2e6   :  { %v222_v37 = vpop.xlane.xlu1 %221 }
 0x2e7   :  { %323 = vrcp.f32 %v222_v37 }
 0x2ea   :  { %v224_v38 = vpop.xlane.xlu1 %223 }
 0x2eb   :  { %325 = vrcp.f32 %v224_v38 }
 0x2f1   :  { %v324_v39 = vpop.eup %323 }
 0x2f2   :  { %v226_v41 = vmul.f32 %v324_v39, %v320_v35 }
 0x2f5   :  { %v326_v40 = vpop.eup %325 }
 0x2f6   :  { %v228_v42 = vmul.f32 %v326_v40, %v322_v36 }
 0x2f8   :  { %v264_v43 = vpack.c.bf16 %v228_v42, %v226_v41 }
 0x2fa   :  { %265 = vst [vmem:[%s406_s5] sm:$0xff] %v264_v43  }

</bundles_post_ra>
